<compile_context>
chip_gen: v5e
topology: v5e:2x2
jax: 0.10.0
libtpu: 0.0.40
codegen_flags: <defaults>
</compile_context>

<pallas_src>
import functools

import jax
import jax.numpy as jnp
from jax.experimental import pallas as pl
from jax.experimental.pallas import tpu as pltpu

SEQUENCE_PAD_TOKEN = 1   # padding_idx of the embedding (row zeroed at init)
VOCAB_SIZE = 30


def _vmem_capacity_bytes() -> int:
    """Physical VMEM of the local TPU; 64 MiB fallback is safe on all gens."""
    try:
        return int(pltpu.get_tpu_info().vmem_capacity_bytes)
    except Exception:
        return 64 * 1024 * 1024


def _embed_kernel(tok_ref, table_ref, out_ref, *, sub, vocab):
    # tok_ref:   (T, K)      int32 token ids, K tokens folded per output row
    # table_ref: (K*V, K*D)  block-diagonal embedding table (plain table if K=1)
    # out_ref:   (T, K*D)    gathered embeddings (lane-dense when K*D % 128 == 0)
    T, K = tok_ref.shape
    KV = table_ref.shape[0]
    table = table_ref[...]
    n_sub = T // sub

    # Hoisted once; JAX does not CSE broadcast/iota inside loops.
    lane = jax.lax.broadcasted_iota(jnp.int32, (sub, KV), 1)

    def body(s, carry):
        r = pl.multiple_of(s * sub, sub)
        tok = tok_ref[pl.ds(r, sub), :]
        # Group j of the block-diagonal table occupies lanes [j*V, (j+1)*V);
        # token j of the row selects lane tok[:, j] + j*V.  Groups are
        # disjoint, so an OR-chain of equalities is the whole one-hot.
        hit = lane == tok[:, 0:1]
        for j in range(1, K):
            hit = hit | (lane == tok[:, j:j + 1] + j * vocab)
        onehot = hit.astype(table.dtype)
        out_ref[pl.ds(r, sub), :] = jnp.dot(
            onehot, table, preferred_element_type=jnp.float32
        ).astype(out_ref.dtype)
        return carry

    jax.lax.fori_loop(0, n_sub, body, 0, unroll=(n_sub <= 8))


def encode_inputs(sequence_tokens: jax.Array, embed_table: jax.Array, *,
                  tile_tokens: int | None = None, out_dtype=None) -> jax.Array:
    """Pallas equivalent of EncodeInputs.forward.

    sequence_tokens: (B, S) integer token ids in [0, 30)
    embed_table:     (30, d_model) embedding weights (padding row is zero)
    out_dtype:       output dtype (default: table dtype).  Pass jnp.bfloat16
                     to halve HBM writeback for bf16 models (exact gather,
                     only the final cast changes).
    Note: out-of-range ids (>= 30) produce zero rows instead of erroring.
    """
    B, S = sequence_tokens.shape
    V, D = embed_table.shape
    N = B * S
    out_dtype = embed_table.dtype if out_dtype is None else jnp.dtype(out_dtype)
    out_row_itemsize = jnp.dtype(out_dtype).itemsize

    # ---- lane-dense fold --------------------------------------------------
    K = 128 // D if (D < 128 and 128 % D == 0) else 1
    N_pad = K * pl.cdiv(N, K)           # pad tokens rather than fall back to K=1
    n_rows = N_pad // K

    tok = sequence_tokens.reshape(-1).astype(jnp.int32)
    if N_pad != N:
        pad = jnp.full((N_pad - N,), SEQUENCE_PAD_TOKEN, dtype=jnp.int32)
        tok = jnp.concatenate([tok, pad])
    tok = tok.reshape(n_rows, K)

    if K == 1:
        table_bd = embed_table
    else:
        # Block-diagonal table kron(eye(K), table) -> (K*V, K*D); tiny, built once.
        table_bd = jnp.kron(jnp.eye(K, dtype=embed_table.dtype), embed_table)

    # ---- generation-aware tile sizing --------------------------------------
    vmem_cap = _vmem_capacity_bytes()
    out_row_bytes = K * D * out_row_itemsize

    if tile_tokens is not None:
        tile_rows = max(1, int(tile_tokens) // K)
    else:
        # Output block >=4 MiB (v7x) / ~8 MiB (v5e/v6e) to hide step overhead.
        target_bytes = (8 << 20) if vmem_cap >= (96 << 20) else (4 << 20)
        tile_rows = max(1, target_bytes // out_row_bytes)

    # Keep >=2 grid steps where possible so ("parallel",) splits rows across
    # v7x's two TensorCores (no effect on v5e/v6e, 1 TC).
    tile_rows = min(tile_rows, 8 * pl.cdiv(n_rows, 16))

    # In-kernel sub-block: bounds the one-hot live range so it stays in vregs.
    sub = 256 if K * V <= 128 else 128

    if tile_rows >= n_rows:
        tile_rows = n_rows              # single block == full array dim
        sub = tile_rows
    else:
        tile_rows = max(8, (tile_rows // 8) * 8)     # sublane multiple
        if tile_rows >= sub:
            tile_rows = min((tile_rows // sub) * sub, 32 * sub)
        else:
            sub = tile_rows

    grid = (pl.cdiv(n_rows, tile_rows),)

    # VMEM budget: ~75% of physical (~96 MiB on v5e/v6e, ~48 MiB on v7x).
    vmem_limit = int(min(100 << 20, max(32 << 20, (vmem_cap * 3) // 4)))

    kernel = functools.partial(_embed_kernel, sub=sub, vocab=V)

    out = pl.pallas_call(
        kernel,
        out_shape=jax.ShapeDtypeStruct((n_rows, K * D), out_dtype),
        grid_spec=pltpu.PrefetchScalarGridSpec(
            num_scalar_prefetch=0,
            grid=grid,
            in_specs=[
                pl.BlockSpec((tile_rows, K), lambda i: (i, 0)),    # token ids
                # Constant index_map -> table DMA'd once, stays VMEM-resident.
                pl.BlockSpec((K * V, K * D), lambda i: (0, 0)),    # table
            ],
            out_specs=pl.BlockSpec((tile_rows, K * D), lambda i: (i, 0)),
        ),
        compiler_params=pltpu.CompilerParams(
            dimension_semantics=("parallel",),     # v7x: shard rows across 2 TCs
            vmem_limit_bytes=vmem_limit,
        ),
    )(tok, table_bd)

    flat = out.reshape(N_pad, D)
    if N_pad != N:
        flat = flat[:N]
    return flat.reshape(B, S, D)


def make_embedding_weights(d_model: int) -> jax.Array:
    """Deterministic synthetic weights matching nn.Embedding(30, d_model,
    padding_idx=SEQUENCE_PAD_TOKEN): N(0,1) init with the padding row zeroed."""
    key = jax.random.PRNGKey(0)
    w = jax.random.normal(key, (VOCAB_SIZE, d_model), dtype=jnp.float32)
    w = w.at[SEQUENCE_PAD_TOKEN].set(0.0)
    return w


if __name__ == "__main__":
    base = jax.random.PRNGKey(0)
    k1, k2, k3 = jax.random.split(base, 3)

    # Case 1: narrow d_model (lane-dense folded path, K = 4), tiny shapes
    d_model = 32
    B, S = 2, 8
    table = make_embedding_weights(d_model)
    seq = jax.random.randint(k1, (B, S), 0, VOCAB_SIZE, dtype=jnp.int32)
    seq = seq.at[0, 0].set(SEQUENCE_PAD_TOKEN)        # hit the zeroed padding row
    out = jax.block_until_ready(encode_inputs(seq, table))
    ref = jnp.take(table, seq, axis=0)
    assert out.shape == (B, S, d_model)
    assert jnp.allclose(out, ref, atol=1e-5, rtol=1e-5)

    # Case 2: wide d_model (K = 1), multi-step grid with a partial last block
    d2 = 256
    table2 = make_embedding_weights(d2)
    seq2 = jax.random.randint(k2, (3, 7), 0, VOCAB_SIZE, dtype=jnp.int32)
    out2 = jax.block_until_ready(encode_inputs(seq2, table2))
    assert jnp.allclose(out2, jnp.take(table2, seq2, axis=0), atol=1e-5, rtol=1e-5)

    # Case 3: folded path, multi-step grid, partial final block
    seq3 = jax.random.randint(k3, (2, 700), 0, VOCAB_SIZE, dtype=jnp.int32)
    out3 = jax.block_until_ready(encode_inputs(seq3, table))
    ref3 = jnp.take(table, seq3, axis=0)
    assert jnp.allclose(out3, ref3, atol=1e-5, rtol=1e-5)

    # Case 3b: user tile_tokens that is not a sublane multiple (rounding path)
    out3b = jax.block_until_ready(encode_inputs(seq3, table, tile_tokens=1000))
    assert jnp.allclose(out3b, ref3, atol=1e-5, rtol=1e-5)

    # Case 4: folded path where N is not a multiple of K (token-padding path)
    seq4 = jax.random.randint(k2, (3, 7), 0, VOCAB_SIZE, dtype=jnp.int32)
    out4 = jax.block_until_ready(encode_inputs(seq4, table))
    assert out4.shape == (3, 7, d_model)
    assert jnp.allclose(out4, jnp.take(table, seq4, axis=0), atol=1e-5, rtol=1e-5)

    # Case 5: bf16 writeback path (exact gather, only the final cast changes)
    out5 = jax.block_until_ready(encode_inputs(seq, table, out_dtype=jnp.bfloat16))
    assert out5.dtype == jnp.bfloat16
    assert jnp.allclose(out5.astype(jnp.float32),
                        ref.astype(jnp.bfloat16).astype(jnp.float32),
                        atol=1e-2, rtol=1e-2)

    print("KERNEL_OK")
</pallas_src>

<mosaic_0001>
module attributes {stable_mosaic.version = 11 : i64} {
  func.func @_embed_kernel(%arg0: i32, %arg1: memref<4x4xi32, #tpu.memory_space<vmem>>, %arg2: memref<120x128xf32, #tpu.memory_space<vmem>>, %arg3: memref<4x128xf32, #tpu.memory_space<vmem>>) attributes {dimension_semantics = [#tpu.dimension_semantics<parallel>], iteration_bounds = array<i64: 1>, scalar_prefetch = 0 : i64, scratch_operands = 0 : i64, tpu.core_type = #tpu.core_type<tc>, window_params = [{transform_indices = @transform_0, window_bounds = array<i64: 4, 4>}, {pipeline_mode = #tpu.pipeline_mode<synchronous>, transform_indices = @transform_1, window_bounds = array<i64: 120, 128>}, {transform_indices = @transform_2, window_bounds = array<i64: 4, 128>}]} {
    %c0 = arith.constant 0 : index
    %c0_0 = arith.constant 0 : index
    %0 = vector.load %arg2[%c0, %c0_0] : memref<120x128xf32, #tpu.memory_space<vmem>>, vector<120x128xf32>
    %1 = tpu.iota {dimensions = array<i32: 1>} : vector<4x120xi32>
    %c0_i32 = arith.constant 0 : i32
    %c4_i32 = arith.constant 4 : i32
    %2 = arith.muli %c0_i32, %c4_i32 : i32
    %3 = tpu.assume_multiple %2, 4 : i32
    %4 = arith.index_cast %3 : i32 to index
    %c0_1 = arith.constant 0 : index
    %5 = vector.load %arg1[%4, %c0_1] : memref<4x4xi32, #tpu.memory_space<vmem>>, vector<4x4xi32>
    %6 = vector.extract_strided_slice %5 {offsets = [0, 0], sizes = [4, 1], strides = [1, 1]} : vector<4x4xi32> to vector<4x1xi32>
    %7 = vector.broadcast %6 : vector<4x1xi32> to vector<4x120xi32>
    %8 = arith.cmpi eq, %1, %7 : vector<4x120xi32>
    %9 = vector.extract_strided_slice %5 {offsets = [0, 1], sizes = [4, 1], strides = [1, 1]} : vector<4x4xi32> to vector<4x1xi32>
    %c30_i32 = arith.constant 30 : i32
    %10 = vector.broadcast %c30_i32 : i32 to vector<4x1xi32>
    %11 = arith.addi %9, %10 : vector<4x1xi32>
    %12 = vector.broadcast %11 : vector<4x1xi32> to vector<4x120xi32>
    %13 = arith.cmpi eq, %1, %12 : vector<4x120xi32>
    %14 = arith.ori %8, %13 : vector<4x120xi1>
    %15 = vector.extract_strided_slice %5 {offsets = [0, 2], sizes = [4, 1], strides = [1, 1]} : vector<4x4xi32> to vector<4x1xi32>
    %c60_i32 = arith.constant 60 : i32
    %16 = vector.broadcast %c60_i32 : i32 to vector<4x1xi32>
    %17 = arith.addi %15, %16 : vector<4x1xi32>
    %18 = vector.broadcast %17 : vector<4x1xi32> to vector<4x120xi32>
    %19 = arith.cmpi eq, %1, %18 : vector<4x120xi32>
    %20 = arith.ori %14, %19 : vector<4x120xi1>
    %21 = vector.extract_strided_slice %5 {offsets = [0, 3], sizes = [4, 1], strides = [1, 1]} : vector<4x4xi32> to vector<4x1xi32>
    %c90_i32 = arith.constant 90 : i32
    %22 = vector.broadcast %c90_i32 : i32 to vector<4x1xi32>
    %23 = arith.addi %21, %22 : vector<4x1xi32>
    %24 = vector.broadcast %23 : vector<4x1xi32> to vector<4x120xi32>
    %25 = arith.cmpi eq, %1, %24 : vector<4x120xi32>
    %26 = arith.ori %20, %25 : vector<4x120xi1>
    %27 = arith.extui %26 : vector<4x120xi1> to vector<4x120xi32>
    %28 = arith.sitofp %27 : vector<4x120xi32> to vector<4x120xf32>
    %cst = arith.constant dense<0.000000e+00> : vector<4x128xf32>
    %29 = tpu.matmul %28, %0, %cst {dimension_numbers = #tpu.dot_dimension_numbers<[1], [0], [0], [1], [0, 0, 1, 1], [], []>} : vector<4x120xf32>, vector<120x128xf32>, vector<4x128xf32> -> vector<4x128xf32>
    %30 = arith.index_cast %3 : i32 to index
    %c0_2 = arith.constant 0 : index
    %31 = vector.load %arg3[%30, %c0_2] : memref<4x128xf32, #tpu.memory_space<vmem>>, vector<4x128xf32>
    tpu.vector_store %arg3[%30, %c0_2], %29 {strides = array<i32>} : memref<4x128xf32, #tpu.memory_space<vmem>>, vector<4x128xf32>,
    %c1_i32 = arith.constant 1 : i32
    return
  }
  func.func @transform_0(%arg0: i32) -> (i32, i32) {
    %c0_i32 = arith.constant 0 : i32
    %c0_i32_0 = arith.constant 0 : i32
    return %arg0, %c0_i32 : i32, i32
  }
  func.func @transform_1(%arg0: i32) -> (i32, i32) {
    %c0_i32 = arith.constant 0 : i32
    %c0_i32_0 = arith.constant 0 : i32
    %c0_i32_1 = arith.constant 0 : i32
    return %c0_i32, %c0_i32_0 : i32, i32
  }
  func.func @transform_2(%arg0: i32) -> (i32, i32) {
    %c0_i32 = arith.constant 0 : i32
    %c0_i32_0 = arith.constant 0 : i32
    return %arg0, %c0_i32 : i32, i32
  }
}

</mosaic_0001>

<bundles_post_ra>
// kernel: tpu_custom_call.1
= control target key start
LH: loop header
LB: loop body
LE: loop exit
PB: predicated region body
PF: predicated region fallthrough
CT: control target
= control target key end

     0   :  { %7 = vsyncpa [#allocation3], 0  ;;  %s256_s0 = inlined_call_operand.hbm [shape: s32[4,4], index: 0, kind: input, shape index: {}]   ;;  %s257_s1 = inlined_call_operand.hbm [shape: f32[120,128], index: 1, kind: input, shape index: {}]   ;;  %s258_s2 = inlined_call_operand.hbm [shape: f32[4,128], index: 2, kind: output, shape index: {}]  }
   0x1   :  { %8 = vsyncpa [#allocation6], 0 }
   0x2   :  { %9 = vsyncpa [#allocation4], 0  ;;  %s15_s11 = sshll.u32 %s256_s0, 4  ;;  %s222_s12 = smov [#allocation2]   ;;  %s16_s11 = int_to_ptr.hbm [resolvable:$true] %s15_s11 }
   0x3   :  { %s17_s13 = sshll.u32 %s222_s12, 4  ;;  %s25_s16 = sshll.u32 %s257_s1, 4  ;;  %s18_s13 = int_to_ptr.vmem [resolvable:$true] %s17_s13  ;;  %s26_s16 = int_to_ptr.hbm [resolvable:$true] %s25_s16 }
   0x4   :  { %20 = dma.hbm_to_vmem [thread:$0]  %s16_s11, 64, %s18_s13, [#allocation3]  }
   0x5   :  { %s223_s17 = smov [#allocation5]   ;;  %s224_s19 = smov 128  }
   0x6   :  { %s27_s18 = sshll.u32 %s223_s17, 4  ;;  %s225_s20 = smov 8   ;;  %s28_s18 = int_to_ptr.vmem [resolvable:$true] %s27_s18 }
   0x7   :  { %33 = dma.hbm_to_vmem [thread:$0]  %s26_s16, 1920, %s28_s18, [#allocation6], %s224_s19, %s224_s19, %s225_s20  }
   0x8   :  { %216 = dma.done.wait [#allocation3], 64  }
   0x9   :  { %217 = vsyncadd [#allocation3], 4294967232 }
   0xa   :  { %218 = dma.done.wait [#allocation6], 1920  }
   0xb   :  { %219 = vsyncadd [#allocation6], 4294965376  ;;  %v226_v0 = vmov 0   ;;  %v227_v1 = vmov 2   ;;  %v59_v2 = vld [vmem:[#allocation2] sm:$0xf]  ;;  %v57_v24 = vlaneseq }
   0xc   :  { %139 = vset.pattern.permute.xlu0 %v226_v0  ;;  %141 = vset.pattern.permute.xlu1 %v227_v1  ;;  %v56_v3 = vld [vmem:[#allocation5 + $0x70] sm:$0xff]  ;;  %v55_v4 = vld [vmem:[#allocation5 + $0x68] sm:$0xff]  ;;  %v70_v5 = vadd.s32 60, %v59_v2  ;;  %v54_v6 = vld [vmem:[#allocation5 + $0x60] sm:$0xff]  ;;  %v64_v8 = vadd.s32 30, %v59_v2  ;;  %v76_v10 = vadd.s32 90, %v59_v2 }
   0xd   :  { %61 = vperm.xlu0 %139, %v59_v2   ;;  %89 = vmatpush.msra.mxu0 %v56_v3  ;;  %v53_v7 = vld [vmem:[#allocation5 + $0x58] sm:$0xff]  ;;  %v52_v9 = vld [vmem:[#allocation5 + $0x50] sm:$0xff]  ;;  %v51_v11 = vld [vmem:[#allocation5 + $0x48] sm:$0xff]  ;;  %v228_v12 = vmov 1   ;;  %v229_v14 = vmov 3   ;;  %v58_v26 = vand.u32 127, %v57_v24 }
   0xe   :  { %72 = vperm.xlu1 %141, %v70_v5   ;;  %v50_v13 = vld [vmem:[#allocation5 + $0x40] sm:$0xff]  ;;  %v49_v15 = vld [vmem:[#allocation5 + $0x38] sm:$0xff]  ;;  %v48_v16 = vld [vmem:[#allocation5 + $0x30] sm:$0xff]  ;;  %vm84_vm6 = vcmask 982016   ;;  %v230_v29 = vmov 0.0   ;;  %s231_s0 = smov [#allocation7]  }
   0xf   :  { %90 = vmatpush.msra.mxu0 %v55_v4  ;;  %v47_v17 = vld [vmem:[#allocation5 + $0x28] sm:$0xff]  ;;  %v46_v18 = vld [vmem:[#allocation5 + $0x20] sm:$0xff]  ;;  %v45_v19 = vld [vmem:[#allocation5 + $0x18] sm:$0xff]  ;;  %s114_s1 = sshll.u32 %s231_s0, 4  ;;  %s116_s23 = sshll.u32 %s258_s2, 4  ;;  %s115_s1 = int_to_ptr.vmem [resolvable:$true] %s114_s1  ;;  %s117_s23 = int_to_ptr.hbm [resolvable:$true] %s116_s23 }
  0x10   :  { %v44_v20 = vld [vmem:[#allocation5 + $0x10] sm:$0xff]  ;;  %v43_v21 = vld [vmem:[#allocation5 + $0x8] sm:$0xff]  ;;  %v42_v22 = vld [vmem:[#allocation5] sm:$0xff] }
  0x11   :  { %91 = vmatpush.msra.mxu0 %v54_v6 }
  0x13   :  { %92 = vmatpush.msra.mxu0 %v53_v7 }
  0x15   :  { %140 = vset.pattern.permute.xlu0 %v228_v12  ;;  %93 = vmatpush.msra.mxu0 %v52_v9 }
  0x16   :  { %66 = vperm.xlu0 %140, %v64_v8   ;;  %142 = vset.pattern.permute.xlu1 %v229_v14 }
  0x17   :  { %94 = vmatpush.msra.mxu0 %v51_v11  ;;  %78 = vperm.xlu1 %142, %v76_v10  }
  0x19   :  { %95 = vmatpush.msra.mxu0 %v50_v13 }
  0x1b   :  { %96 = vmatpush.msra.mxu0 %v49_v15 }
  0x1d   :  { %97 = vmatpush.msra.mxu0 %v48_v16 }
  0x1e   :  { %143 = vset.pattern.permute.xlu0 %v229_v14 }
  0x1f   :  { %98 = vmatpush.msra.mxu0 %v47_v17 }
  0x21   :  { %99 = vmatpush.msra.mxu0 %v46_v18 }
  0x23   :  { %100 = vmatpush.msra.mxu0 %v45_v19 }
  0x25   :  { %101 = vmatpush.msra.mxu0 %v44_v20 }
  0x27   :  { %102 = vmatpush.msra.mxu0 %v43_v21 }
  0x29   :  { %103 = vmatpush.msra.mxu0 %v42_v22 }
  0x7f   :  { %v62_v23 = vpop.permute.xlu0 %61 }
  0x80   :  { %v73_v25 = vpop.permute.xlu1 %72  ;;  %vm63_vm0 = vcmp.eq.s32.totalorder %v58_v26, %v62_v23 }
  0x81   :  { %vm74_vm2 = vcmp.eq.s32.totalorder %v58_v26, %v73_v25 }
  0x88   :  { %v67_v27 = vpop.permute.xlu0 %66 }
  0x89   :  { %vm68_vm1 = vcmp.eq.s32.totalorder %v58_v26, %v67_v27  ;;  %v79_v28 = vpop.permute.xlu1 %78 }
  0x8a   :  { %vm69_vm3 = vmor %vm63_vm0, %vm68_vm1  ;;  %vm80_vm5 = vcmp.eq.s32.totalorder %v58_v26, %v79_v28 }
  0x8b   :  { %vm75_vm4 = vmor %vm69_vm3, %vm74_vm2 }
  0x8c   :  { %vm81_vm7 = vmor %vm75_vm4, %vm80_vm5 }
  0x8d   :  { %v127_v30 = vsel %vm81_vm7, 1.0, %v230_v29 }
  0x8e   :  { %128 = vmatmul.msk.f32.vlgmr.msra.gmra.mxu0 %vm84_vm6, %v127_v30 }
 0x10b   :  { %v105_v31 = vpop.f32.mrf.mxu0 }
 0x10c   :  { %108 = vst [vmem:[#allocation7] sm:$0xf] %v105_v31 }
 0x10d   :  { %119 = dma.vmem_to_hbm [thread:$0]  %s115_s1, 64, %s117_s23, [#allocation4]  }
 0x10e   :  { %220 = dma.done.wait [#allocation4], 64  }
 0x10f   :  { %221 = vsyncadd [#allocation4], 4294967232 }
 0x110   :  { %124 = vsyncpa [#allocation3], 1 }
 0x111   :  { %125 = vsyncpa [#allocation6], 1 }
 0x112   :  { %126 = vsyncpa [#allocation4], 1 }

</bundles_post_ra>
